<compile_context>
chip_gen: v6e
topology: v6e:2x2x1
jax: 0.10.0
libtpu: 0.0.40
codegen_flags: <defaults>
</compile_context>

<pallas_src>
import jax
import jax.numpy as jnp
from jax.experimental import pallas as pl
from jax.experimental.pallas import tpu as pltpu


def _grn_kernel(x_ref, gamma_ref, beta_ref, o_ref):
    # x_ref block: (bn, C, HW) -- HW lane-dense (full dim), C on sublanes.
    x = x_ref[...]

    # Gx = ||x||_2 over spatial dims per (n, c): accumulate sum-of-squares in
    # f32 regardless of the input dtype, reduce over the lane (HW) axis.
    x32 = x.astype(jnp.float32)
    sumsq = jnp.sum(x32 * x32, axis=-1, keepdims=True)      # (bn, C, 1) f32
    gx = jnp.sqrt(sumsq)                                     # (bn, C, 1)

    # Nx = Gx / (mean_c(Gx) + 1e-6): sublane reduce over C + one exact divide
    # on a tiny vector (off the per-element critical path, so exact is free).
    gmean = jnp.mean(gx, axis=1, keepdims=True)              # (bn, 1, 1)
    nx = gx / (gmean + 1e-6)                                 # (bn, C, 1)

    gamma = gamma_ref[...].astype(jnp.float32)[None]         # (1, C, 1)
    beta = beta_ref[...].astype(jnp.float32)[None]           # (1, C, 1)

    # Fused epilogue: gamma*(x*Nx) + beta + x == x*(gamma*Nx + 1) + beta.
    # Per-channel scalars are computed in f32 then cast once to the input
    # dtype, so the 2-op/element epilogue runs native-width (bf16 on v6e/v7x).
    scale = (gamma * nx + 1.0).astype(x.dtype)               # (bn, C, 1)
    out = x * scale + beta.astype(x.dtype)                   # (bn, C, HW)
    o_ref[...] = out.astype(o_ref.dtype)


def _pick_block_batch(n, per_sample_bytes, target_block_bytes=2 << 20,
                      min_grid_steps=4):
    """Samples per grid step.

    Big enough that each DMA tile is ~2 MiB (well past the ~0.35us/step
    overhead knee), but keeping >= `min_grid_steps` grid steps when possible so
    both v7x TensorCores get >= 2 pipelined steps each (on v5e/v6e the floor is
    harmless: it never pushes a block below one sample).  The grid uses cdiv,
    so bn does not have to divide N (ragged tail is safe: per-sample math).
    """
    per = max(per_sample_bytes, 1)
    bn = max(1, min(n, target_block_bytes // per))
    if bn > 1 and n // bn < min_grid_steps:
        bn = max(1, n // min_grid_steps)
    return bn


def grn(x, gamma, beta):
    """x: (N, C, H, W); gamma, beta: (1, C, 1, 1). Returns (N, C, H, W)."""
    N, C, H, W = x.shape
    HW = H * W

    # Contiguous reshape only -- no HBM relayout, kernel works in native NCHW.
    x3 = x.reshape(N, C, HW)
    g2 = gamma.reshape(C, 1)
    b2 = beta.reshape(C, 1)

    itemsize = jnp.dtype(x.dtype).itemsize
    bn = _pick_block_batch(N, C * HW * itemsize)
    grid = (pl.cdiv(N, bn),)

    cost = pl.CostEstimate(
        flops=6 * N * C * HW,            # sumsq (mul+add), scale mul, beta add, ...
        transcendentals=N * C,           # per-(n, c) sqrt
        bytes_accessed=2 * N * C * HW * itemsize + 2 * C * itemsize,
    )

    # NOTE: callers that can donate x (e.g. under jit where x is a dead
    # intermediate) should additionally pass input_output_aliases={0: 0} to
    # elide the output HBM allocation; omitted here so the eager test keeps x.
    out3 = pl.pallas_call(
        _grn_kernel,
        out_shape=jax.ShapeDtypeStruct((N, C, HW), x.dtype),
        grid_spec=pltpu.PrefetchScalarGridSpec(
            num_scalar_prefetch=0,
            grid=grid,
            in_specs=[
                pl.BlockSpec((bn, C, HW), lambda n: (n, 0, 0)),
                pl.BlockSpec((C, 1), lambda n: (0, 0)),
                pl.BlockSpec((C, 1), lambda n: (0, 0)),
            ],
            out_specs=pl.BlockSpec((bn, C, HW), lambda n: (n, 0, 0)),
        ),
        compiler_params=pltpu.CompilerParams(
            dimension_semantics=("parallel",),
            vmem_limit_bytes=32 << 20,
        ),
        cost_estimate=cost,
    )(x3, g2, b2)
    return out3.reshape(N, C, H, W)


def grn_ref(x, gamma, beta):
    """Pure-JAX reference matching the PyTorch forward exactly."""
    gx = jnp.sqrt(jnp.sum(x.astype(jnp.float32) ** 2, axis=(2, 3), keepdims=True))
    nx = gx / (jnp.mean(gx, axis=1, keepdims=True) + 1e-6)
    return (gamma * (x * nx) + beta + x).astype(x.dtype)


if __name__ == "__main__":
    key = jax.random.PRNGKey(0)
    kx, kg, kb = jax.random.split(key, 3)

    # N=8 so both the sample-batching (bn=2 per block) and the multi-step grid
    # (4 steps) are exercised while shapes stay small.
    N, C, H, W = 8, 4, 16, 16
    x = jax.random.normal(kx, (N, C, H, W), dtype=jnp.float32)
    # The module initializes gamma/beta to zeros; use deterministic non-zero
    # values so the normalization path is actually exercised.
    gamma = 0.1 * jax.random.normal(kg, (1, C, 1, 1), dtype=jnp.float32)
    beta = 0.1 * jax.random.normal(kb, (1, C, 1, 1), dtype=jnp.float32)

    ref = grn_ref(x, gamma, beta)

    out = grn(x, gamma, beta)
    out = jax.block_until_ready(out)

    assert out.shape == (N, C, H, W)
    assert out.dtype == x.dtype
    # Exact divide + f32 math everywhere: only fusion/reduction reorder remains.
    max_err = jnp.max(jnp.abs(out - ref))
    assert jnp.allclose(out, ref, atol=1e-5, rtol=1e-5), (
        f"mismatch vs reference: max abs err {max_err}")

    print("KERNEL_OK")
</pallas_src>

<mosaic_0001>
module attributes {stable_mosaic.version = 11 : i64} {
  func.func @_grn_kernel(%arg0: i32, %arg1: memref<2x4x256xf32, #tpu.memory_space<vmem>>, %arg2: memref<4x1xf32, #tpu.memory_space<vmem>>, %arg3: memref<4x1xf32, #tpu.memory_space<vmem>>, %arg4: memref<2x4x256xf32, #tpu.memory_space<vmem>>) attributes {dimension_semantics = [#tpu.dimension_semantics<parallel>], iteration_bounds = array<i64: 4>, scalar_prefetch = 0 : i64, scratch_operands = 0 : i64, tpu.core_type = #tpu.core_type<tc>, window_params = [{transform_indices = @transform_0, window_bounds = array<i64: 2, 4, 256>}, {pipeline_mode = #tpu.pipeline_mode<synchronous>, transform_indices = @transform_1, window_bounds = array<i64: 4, 1>}, {pipeline_mode = #tpu.pipeline_mode<synchronous>, transform_indices = @transform_2, window_bounds = array<i64: 4, 1>}, {transform_indices = @transform_3, window_bounds = array<i64: 2, 4, 256>}]} {
    %c0 = arith.constant 0 : index
    %c0_0 = arith.constant 0 : index
    %c0_1 = arith.constant 0 : index
    %0 = vector.load %arg1[%c0, %c0_0, %c0_1] : memref<2x4x256xf32, #tpu.memory_space<vmem>>, vector<2x4x256xf32>
    %1 = arith.mulf %0, %0 : vector<2x4x256xf32>
    %cst = arith.constant dense<0.000000e+00> : vector<2x4xf32>
    %2 = vector.multi_reduction <add>, %1, %cst [2] : vector<2x4x256xf32> to vector<2x4xf32>
    %3 = vector.shape_cast %2 : vector<2x4xf32> to vector<2x4x1xf32>
    %4 = math.sqrt %3 : vector<2x4x1xf32>
    %cst_2 = arith.constant dense<0.000000e+00> : vector<2x1xf32>
    %5 = vector.multi_reduction <add>, %4, %cst_2 [1] : vector<2x4x1xf32> to vector<2x1xf32>
    %6 = vector.shape_cast %5 : vector<2x1xf32> to vector<2x1x1xf32>
    %cst_3 = arith.constant 4.000000e+00 : f32
    %7 = vector.broadcast %cst_3 : f32 to vector<2x1x1xf32>
    %8 = arith.divf %6, %7 : vector<2x1x1xf32>
    %cst_4 = arith.constant 9.99999997E-7 : f32
    %9 = vector.broadcast %cst_4 : f32 to vector<2x1x1xf32>
    %10 = arith.addf %8, %9 : vector<2x1x1xf32>
    %11 = vector.broadcast %10 : vector<2x1x1xf32> to vector<2x4x1xf32>
    %12 = arith.divf %4, %11 : vector<2x4x1xf32>
    %c0_5 = arith.constant 0 : index
    %c0_6 = arith.constant 0 : index
    %13 = vector.load %arg2[%c0_5, %c0_6] : memref<4x1xf32, #tpu.memory_space<vmem>>, vector<4x1xf32>
    %14 = vector.shape_cast %13 : vector<4x1xf32> to vector<1x4x1xf32>
    %c0_7 = arith.constant 0 : index
    %c0_8 = arith.constant 0 : index
    %15 = vector.load %arg3[%c0_7, %c0_8] : memref<4x1xf32, #tpu.memory_space<vmem>>, vector<4x1xf32>
    %16 = vector.shape_cast %15 : vector<4x1xf32> to vector<1x4x1xf32>
    %17 = vector.broadcast %14 : vector<1x4x1xf32> to vector<2x4x1xf32>
    %18 = arith.mulf %17, %12 : vector<2x4x1xf32>
    %cst_9 = arith.constant 1.000000e+00 : f32
    %19 = vector.broadcast %cst_9 : f32 to vector<2x4x1xf32>
    %20 = arith.addf %18, %19 : vector<2x4x1xf32>
    %21 = vector.broadcast %20 : vector<2x4x1xf32> to vector<2x4x256xf32>
    %22 = arith.mulf %0, %21 : vector<2x4x256xf32>
    %23 = vector.broadcast %16 : vector<1x4x1xf32> to vector<2x4x256xf32>
    %24 = arith.addf %22, %23 : vector<2x4x256xf32>
    %c0_10 = arith.constant 0 : index
    %c0_11 = arith.constant 0 : index
    %c0_12 = arith.constant 0 : index
    %25 = vector.load %arg4[%c0_10, %c0_11, %c0_12] : memref<2x4x256xf32, #tpu.memory_space<vmem>>, vector<2x4x256xf32>
    tpu.vector_store %arg4[%c0_10, %c0_11, %c0_12], %24 {strides = array<i32>} : memref<2x4x256xf32, #tpu.memory_space<vmem>>, vector<2x4x256xf32>,
    return
  }
  func.func @transform_0(%arg0: i32) -> (i32, i32, i32) {
    %c0_i32 = arith.constant 0 : i32
    %c0_i32_0 = arith.constant 0 : i32
    %c0_i32_1 = arith.constant 0 : i32
    return %arg0, %c0_i32, %c0_i32_0 : i32, i32, i32
  }
  func.func @transform_1(%arg0: i32) -> (i32, i32) {
    %c0_i32 = arith.constant 0 : i32
    %c0_i32_0 = arith.constant 0 : i32
    %c0_i32_1 = arith.constant 0 : i32
    return %c0_i32, %c0_i32_0 : i32, i32
  }
  func.func @transform_2(%arg0: i32) -> (i32, i32) {
    %c0_i32 = arith.constant 0 : i32
    %c0_i32_0 = arith.constant 0 : i32
    %c0_i32_1 = arith.constant 0 : i32
    return %c0_i32, %c0_i32_0 : i32, i32
  }
  func.func @transform_3(%arg0: i32) -> (i32, i32, i32) {
    %c0_i32 = arith.constant 0 : i32
    %c0_i32_0 = arith.constant 0 : i32
    %c0_i32_1 = arith.constant 0 : i32
    return %arg0, %c0_i32, %c0_i32_0 : i32, i32, i32
  }
}

</mosaic_0001>

<bundles_post_ra>
// kernel: tpu_custom_call.1
= control target key start
LH: loop header
LB: loop body
LE: loop exit
PB: predicated region body
PF: predicated region fallthrough
CT: control target
= control target key end

     0   :  { %8 = vsyncpa [#allocation3], 0  ;;  %s768_s0 = inlined_call_operand.hbm [shape: f32[8,4,256], index: 0, kind: input, shape index: {}]   ;;  %s769_s1 = inlined_call_operand.vmem [shape: f32[4,1], index: 1, kind: input, shape index: {}]   ;;  %s770_s2 = inlined_call_operand.vmem [shape: f32[4,1], index: 2, kind: input, shape index: {}]   ;;  %s771_s3 = inlined_call_operand.hbm [shape: f32[8,4,256], index: 3, kind: output, shape index: {}]  }
   0x1   :  { %10 = vsyncpa [#allocation3 + $0x1], 0 }
   0x2   :  { %11 = vsyncpa [#allocation4], 0 }
   0x3   :  { %13 = vsyncpa [#allocation4 + $0x1], 0  ;;  %s590_s12 = smov 0   ;;  %s592_s13 = smov 0  }
   0x4   :  { %s594_s14 = smov 0   ;;  %s596_s15 = smov 0  }
   0x5 LB: > { %s611_s16 = sadd.s32 4294967295, %s560_s15   ;;  %s386_s17 = sadd.s32 4294967294, %s560_s15   ;;  %s560_s15 = sphi %s596_s15, %s785_s15   ;;  %s556_s14 = sphi %s594_s14, %s784_s14   ;;  %s552_s13 = sphi %s592_s13, %s783_s13   ;;  %s548_s12 = sphi %s590_s12, %s782_s12  }
   0x6   : > { %s615_s18 = sadd.s32 1, %s560_s15   ;;  %s26_s19 = sadd.s32 1, %s556_s14 }
   0x7   : > { %s23_s20 = ssub.s32 %s560_s15, %s615_s18  ;;  %p33_p0 = scmp.ne.s32.totalorder %s556_s14, %s552_s13 }
   0x8   : > { %p24_p1 = scmp.eq.s32.totalorder %s23_s20, 0  ;;  %p34_p2 = scmp.eq.s32.totalorder %s560_s15, 0 }
   0x9   : > { %p39_p3 = scmp.ne.s32.totalorder %s552_s13, %s548_s12  ;;  %p40_p4 = scmp.eq.s32.totalorder %s611_s16, 0 }
   0xa   : > { %s627_s21 = scalar_select %p24_p1, %s556_s14, %s26_s19  }
   0xb   : > { %p629_p5 = por %p34_p2, %p33_p0  ;;  %p633_p6 = por %p40_p4, %p39_p3 }
   0xc   : > { %p105_p7 = scmp.eq.s32.totalorder %s611_s16, 3  ;;  %p111_p8 = scmp.eq.s32.totalorder %s386_s17, 3 }
   0xd   : > { %s775_s23 = scalar_select %p633_p6, 1, 0 }
   0xe   : > { %p418_p9 = scmp.lt.s32.totalorder %s560_s15, 4  ;;  %p639_p10 = por %p105_p7, %p33_p0 }
   0xf   : > { %p643_p11 = por %p111_p8, %p39_p3  ;;  %s137_s26 = sand.u32 1, %s556_s14  }
  0x10   : > { %s776_s24 = scalar_select %p639_p10, 1, 0 }
  0x11   : > { %s777_s25 = scalar_select %p643_p11, 1, 0 }
  0x12   : > { %s403_s27 = sshll.u32 %s560_s15, 8  ;;  %s389_s28 = sshll.u32 %s137_s26, 4 }
  0x13   : > { %s652_s4 = scalar_lea.hbm %s768_s0, %s403_s27  ;;  %s141_s5 = scalar_lea.vmem [#allocation2], %s389_s28 }
  0x14   : > { %s149_s6 = sshll.u32 %s141_s5, 4  ;;  %p656_p12 = pnand %p418_p9, %p629_p5  ;;  %s660_s6 = int_to_ptr.vmem [resolvable:$true] %s149_s6 }
  0x15   : > { %s662_s8 = scalar_lea.sflag [#allocation3], %s137_s26  ;;  %s468_s9 = scalar_lea.hbm %s652_s4, 256 }
  0x16   : > { %p469_p13 = scmp.ne.s32.totalorder %s652_s4, %s468_s9  ;;  %p470_p0 = pneg %p656_p12 }
  0x17   : > { %s473_s17 = scalar_lea.hbm %s768_s0, 1024  ;;  %p474_p3 = scmp.lt.s32.totalorder %s652_s4, %s768_s0 }
  0x18   : > { %p471_p1 = pnand %p470_p0, %p469_p13  ;;  %p475_p4 = scmp.lt.s32.totalorder %s473_s17, %s468_s9 }
  0x1a   : > { %p472_p2 = pneg %p471_p1  ;;  %p476_p5 = por %p475_p4, %p474_p3 }
  0x1c   : > { %p477_p7 = pnand %p476_p5, %p472_p2 }
  0x1e   : > { %480 = shalt.err (!%p477_p7)
}
  0x1f   : > { %s481_s22 = scalar_lea.vmem %s660_s6, 256  ;;  %s562_s26 = smov [#allocation2]  }
  0x20   : > { %p482_p8 = scmp.ne.s32.totalorder %s660_s6, %s481_s22  ;;  %s486_s27 = sshll.u32 %s562_s26, 4  ;;  %s487_s27 = int_to_ptr.vmem [resolvable:$false] %s486_s27 }
  0x21   : > { %s488_s28 = scalar_lea.vmem %s487_s27, 512  ;;  %p489_p1 = scmp.lt.s32.totalorder %s660_s6, %s487_s27 }
  0x22   : > { %p484_p9 = pnand %p482_p8, %p470_p0  ;;  %p490_p11 = scmp.lt.s32.totalorder %s488_s28, %s481_s22 }
  0x24   : > { %p485_p13 = pneg %p484_p9  ;;  %p491_p10 = por %p490_p11, %p489_p1 }
  0x26   : > { %p492_p6 = pnand %p491_p10, %p485_p13 }
  0x28   : > { %495 = shalt.err (!%p492_p6)
}
  0x29   : > { %s563_s29 = smov 128   ;;  %s564_s30 = smov 8  }
  0x2a   : > { %413 = dma.hbm_to_vmem [thread:$0]  (!%p656_p12), %s652_s4, 256, %s660_s6, %s662_s8, %s563_s29, %s563_s29, %s564_s30  }
  0x2b   : > { %p393_p0 = scmp.ge.s32.totalorder %s560_s15, 1  ;;  %p157_p2 = scmp.lt.s32.totalorder %s560_s15, 5 }
  0x2d   : > { %p158_p3 = pnand %p393_p0, %p157_p2 }
  0x2e   : > { %s686_s5 = sand.u32 (!%p158_p3), 1, %s552_s13   ;;  %p779_p6 = scmp.ne.s32.totalorder (!%p158_p3), %s775_s23, 0 }
  0x2f   : > { %161 = sbr.rel (%p158_p3) target bundleno = 402 (0x192), region = 32  ;;  %s394_s9 = sshll.u32 (!%p158_p3), %s686_s5, 4 }
  0x30   : > { %s164_s10 = scalar_lea.sflag (!%p158_p3), [#allocation3], %s686_s5  ;;  %s167_s11 = scalar_lea.vmem (!%p158_p3), [#allocation2], %s394_s9 }
  0x34   : > { %539 = dma.done.wait (%p779_p6), %s164_s10, 256  }
  0x35   : > { %541 = vsyncadd (%p779_p6), %s164_s10, 4294967040  ;;  %v696_v0 = vld [vmem:[%s167_s11] sm:$0xff]  ;;  %vm202_vm0 = vcmask 1043456   ;;  %v698_v1 = vld [vmem:[%s167_s11 + $0x8] sm:$0xff]  ;;  %v565_v12 = vmov 0   ;;  %v267_v55 = vlaneseq  ;;  %s189_s8 = scalar_lea.vmem [#allocation5], %s394_s9 }
  0x36   : > { %v194_v2 = vmul.f32 %v696_v0, %v696_v0  ;;  %v195_v3 = vmul.f32 %v698_v1, %v698_v1  ;;  %458 = vset.pattern.permute.xlu1 %v565_v12  ;;  %459 = vset.pattern.permute.xlu0 %v565_v12  ;;  %v251_v13 = vld [vmem:[%s770_s2] sm:$0xf]  ;;  %v566_v53 = vmov 839922192   ;;  %s313_s17 = sshll.u32 %s189_s8, 4  ;;  %s405_s19 = sshll.u32 %s611_s16, 8  ;;  %s720_s17 = int_to_ptr.vmem [resolvable:$true] %s313_s17 }
  0x37   : > { %v250_v45 = vld [vmem:[%s769_s1] sm:$0xf]  ;;  %v265_v54 = vunpack.c.l.s4 %v566_v53  ;;  %v268_v57 = vshrl.u32 %v267_v55, 7  ;;  %s726_s26 = scalar_lea.hbm %s771_s3, %s405_s19  ;;  %s299_s27 = scalar_lea.sflag [#allocation4], %s686_s5 }
  0x38   : > { %v198_v4 = vcombine.high %v194_v2, %v194_v2  ;;  %v203_v5 = vsel %vm202_vm0, %v194_v2, 0.0  ;;  %v199_v6 = vcombine.high %v195_v3, %v195_v3  ;;  %v208_v8 = vsel %vm202_vm0, %v195_v3, 0.0  ;;  %s496_s28 = scalar_lea.vmem %s720_s17, 256  ;;  %p780_p11 = scmp.ne.s32.totalorder %s776_s24, 0 }
  0x39   : > { %v266_v56 = vunpack.c.0.s8 %v265_v54  ;;  %p497_p10 = scmp.ne.s32.totalorder %s720_s17, %s496_s28  ;;  %s567_s16 = smov [#allocation5]  }
  0x3a   : > { %v204_v7 = vsel %vm202_vm0, %v198_v4, 0.0  ;;  %v209_v9 = vsel %vm202_vm0, %v199_v6, 0.0  ;;  %s500_s29 = sshll.u32 %s567_s16, 4  ;;  %s501_s29 = int_to_ptr.vmem [resolvable:$false] %s500_s29 }
  0x3b   : > { %v205_v10 = vadd.f32 %v204_v7, %v203_v5  ;;  %v210_v11 = vadd.f32 %v209_v9, %v208_v8  ;;  %v269_v58 = vsub.s32 %v266_v56, %v268_v57  ;;  %p498_p12 = pnand %p497_p10, %p780_p11  ;;  %s502_s30 = scalar_lea.vmem %s501_s29, 512 }
  0x3c   : > { %p503_p5 = scmp.lt.s32.totalorder %s720_s17, %s501_s29  ;;  %p504_p7 = scmp.lt.s32.totalorder %s502_s30, %s496_s28 }
  0x3d   : > { %206 = vadd.xlane.f32.xlu0 %v205_v10  ;;  %p499_p4 = pneg %p498_p12 }
  0x3e   : > { %p505_p8 = por %p504_p7, %p503_p5 }
  0x40   : > { %p506_p9 = pnand %p505_p8, %p499_p4 }
  0x41   : > { %211 = vadd.xlane.f32.xlu0 %v210_v11 }
  0x57   : > { %284 = vperm.xlu0 %459, %v251_v13  }
  0xc6   : > { %v207_v14 = vpop.xlane.xlu0 %206 }
  0xc7   : > { %460 = vrsqrt.f32 %v207_v14  ;;  %vm215_vm1 = vcmp.eq.f32.partialorder %v207_v14, inf  ;;  %v218_v18 = vand.u32 2147483648, %v207_v14  ;;  %vm217_vm2 = vcmp.eq.f32.partialorder %v207_v14, 0.0 }
  0xca   : > { %v212_v15 = vpop.xlane.xlu0 %211 }
  0xcb   : > { %462 = vrsqrt.f32 %v212_v15  ;;  %vm222_vm3 = vcmp.eq.f32.partialorder %v212_v15, inf  ;;  %v225_v25 = vand.u32 2147483648, %v212_v15  ;;  %vm224_vm4 = vcmp.eq.f32.partialorder %v212_v15, 0.0 }
  0xd2   : > { %v285_v59 = vpop.permute.xlu0 %284 }
  0xd3   : > { %v292_v62 = vrot.slane %v285_v59, %v269_v58 }
  0xd4   : > { %v461_v16 = vpop.eup %460 }
  0xd5   : > { %v214_v17 = vmul.f32 %v461_v16, %v207_v14 }
  0xd7   : > { %v216_v19 = vsel %vm215_vm1, %v207_v14, %v214_v17 }
  0xd8   : > { %v463_v20 = vpop.eup %462  ;;  %v219_v21 = vsel %vm217_vm2, %v218_v18, %v216_v19 }
  0xd9   : > { %v221_v22 = vmul.f32 %v463_v20, %v212_v15  ;;  %v227_v23 = vsel %vm202_vm0, %v219_v21, 0.0 }
  0xda   : > { %v228_v24 = vrot.slane %v227_v23, 4 }
  0xdb   : > { %v223_v26 = vsel %vm222_vm3, %v212_v15, %v221_v22 }
  0xdc   : > { %v229_v27 = vadd.f32 %v228_v24, %v227_v23  ;;  %v226_v28 = vsel %vm224_vm4, %v225_v25, %v223_v26 }
  0xdd   : > { %v234_v29 = vsel %vm202_vm0, %v226_v28, 0.0 }
  0xde   : > { %v230_v30 = vrot.slane %v229_v27, 2  ;;  %v235_v31 = vrot.slane %v234_v29, 4 }
  0xe0   : > { %v231_v32 = vadd.f32 %v230_v30, %v229_v27  ;;  %v236_v33 = vadd.f32 %v235_v31, %v234_v29 }
  0xe2   : > { %v232_v34 = vrot.slane %v231_v32, 1  ;;  %v237_v35 = vrot.slane %v236_v33, 2 }
  0xe4   : > { %v233_v36 = vadd.f32 %v232_v34, %v231_v32  ;;  %v238_v37 = vadd.f32 %v237_v35, %v236_v33 }
  0xe6   : > { %v242_v38 = vmul.f32 0.25, %v233_v36  ;;  %v239_v39 = vrot.slane %v238_v37, 1 }
  0xe8   : > { %v244_v40 = vadd.f32 1e-06, %v242_v38  ;;  %v240_v41 = vadd.f32 %v239_v39, %v238_v37 }
  0xea   : > { %464 = vrcp.f32 %v244_v40  ;;  %v243_v42 = vmul.f32 0.25, %v240_v41 }
  0xec   : > { %v245_v43 = vadd.f32 1e-06, %v243_v42 }
  0xee   : > { %466 = vrcp.f32 %v245_v43 }
  0xf7   : > { %v465_v44 = vpop.eup %464 }
  0xf8   : > { %v247_v46 = vmul.f32 %v465_v44, %v219_v21 }
  0xfa   : > { %v252_v47 = vmul.f32 %v250_v45, %v247_v46 }
  0xfb   : > { %v467_v48 = vpop.eup %466 }
  0xfc   : > { %v254_v49 = vadd.f32 1.0, %v252_v47  ;;  %v249_v50 = vmul.f32 %v467_v48, %v226_v28 }
  0xfe   : > { %258 = vperm.xlu1 %458, %v254_v49   ;;  %v253_v51 = vmul.f32 %v250_v45, %v249_v50 }
 0x100   : > { %v255_v52 = vadd.f32 1.0, %v253_v51 }
 0x102   : > { %262 = vperm.xlu1 %458, %v255_v52  }
 0x179   : > { %v259_v60 = vpop.permute.xlu1 %258 }
 0x17a   : > { %v270_v61 = vrot.slane %v259_v60, %v269_v58 }
 0x17c   : > { %v280_v63 = vmul.f32 %v270_v61, %v696_v0 }
 0x17d   : > { %v263_v2 = vpop.permute.xlu1 %262 }
 0x17e   : > { %v294_v3 = vadd.f32 %v292_v62, %v280_v63  ;;  %v277_v4 = vrot.slane %v263_v2, %v269_v58 }
 0x180   : > { %296 = vst [vmem:[%s189_s8] sm:$0xff] %v294_v3  ;;  %v281_v5 = vmul.f32 %v277_v4, %v698_v1 }
 0x182   : > { %v295_v0 = vadd.f32 %v292_v62, %v281_v5 }
 0x184   : > { %297 = vst [vmem:[%s189_s8 + $0x8] sm:$0xff] %v295_v0 }
 0x185   : > { %509 = shalt.err (!%p506_p9)
}
 0x186   : > { %s510_s9 = scalar_lea.hbm %s726_s26, 256  ;;  %s514_s23 = scalar_lea.hbm %s771_s3, 1024 }
 0x187   : > { %p511_p13 = scmp.ne.s32.totalorder %s726_s26, %s510_s9  ;;  %p515_p2 = scmp.lt.s32.totalorder %s726_s26, %s771_s3 }
 0x188   : > { %p516_p3 = scmp.lt.s32.totalorder %s514_s23, %s510_s9 }
 0x189   : > { %p512_p1 = pnand %p511_p13, %p780_p11 }
 0x18a   : > { %p517_p6 = por %p516_p3, %p515_p2 }
 0x18b   : > { %p513_p0 = pneg %p512_p1 }
 0x18d   : > { %p518_p10 = pnand %p517_p6, %p513_p0 }
 0x18f   : > { %521 = shalt.err (!%p518_p10)
}
 0x190   : > { %s568_s7 = smov 128   ;;  %s569_s8 = smov 8  }
 0x191   : > { %408 = dma.vmem_to_hbm [thread:$0]  (%p780_p11), %s720_s17, 256, %s726_s26, %s299_s27, %s568_s7, %s568_s7, %s569_s8  }
 0x192 PF: > { %p419_p12 = scmp.ge.s32.totalorder %s560_s15, 2  ;;  %s328_s19 = sand.u32 1, %s548_s12  }
 0x193   : > { %p781_p4 = scmp.ne.s32.totalorder %s777_s25, 0  ;;  %s329_s20 = scalar_lea.sflag [#allocation4], %s328_s19 }
 0x195   : > { %p415_p5 = pnand %p419_p12, %p781_p4 }
 0x197   : > { %p416_p7 = pneg %p415_p5 }
 0x199   : > { %543 = dma.done.wait (%p416_p7), %s329_s20, 256  }
 0x19a   : > { %545 = vsyncadd (%p416_p7), %s329_s20, 4294967040  ;;  %p16_p8 = scmp.ge.s32.totalorder %s615_s18, 6   ;;  %s782_s12 = smov %s552_s13 }
 0x19b   : > { %s783_s13 = smov %s556_s14  ;;  %s784_s14 = smov %s627_s21 }
 0x19c   : > { %s785_s15 = smov %s615_s18  ;;  %18 = sbr.rel (!%p16_p8) target bundleno = 5 (0x5), region = 77 }
 0x1a1   :  { %334 = vsyncpa [#allocation3], 1 }
 0x1a2   :  { %336 = vsyncpa [#allocation3 + $0x1], 1 }
 0x1a3   :  { %337 = vsyncpa [#allocation4], 1 }
 0x1a4   :  { %339 = vsyncpa [#allocation4 + $0x1], 1 }

</bundles_post_ra>
